<compile_context>
chip_gen: v5e
topology: v5e:2x2
jax: 0.10.0
libtpu: 0.0.40
codegen_flags: <defaults>
</compile_context>

<pallas_src>
import functools

import jax
import jax.numpy as jnp
import numpy as np
from jax.experimental import pallas as pl
from jax.experimental.pallas import tpu as pltpu


def _round_up(x, m):
    return ((x + m - 1) // m) * m


def moe_kernel(x_ref, w_lg_ref, b_lg_ref, w_hf_ref, b_hf_ref,
               cs_out_ref, b_out_ref, o_ref, *, top_k, n_exp):
    x = x_ref[...]                                                  # [TM, in_dim]

    # ---- fused in_proj + router (backbone == identity, see TODO below) ----
    logits = jnp.dot(x, w_lg_ref[...],
                     preferred_element_type=jnp.float32) + b_lg_ref[...]   # [TM, n_exp]
    # Only the first n_exp columns of h are ever gathered (indices < n_exp).
    h_front = jnp.dot(x, w_hf_ref[...],
                      preferred_element_type=jnp.float32) + b_hf_ref[...]  # [TM, n_exp]

    # TODO(synk): frozen deepseek-coder-7b backbone (hidden_states[-1]) cannot be
    # reproduced in-script (no checkpoint); it is treated as identity, which is
    # what makes the in_proj/router fusion above valid.

    # ---- softmax ----
    m = jnp.max(logits, axis=-1, keepdims=True)
    e = jnp.exp(logits - m)
    w = e / jnp.sum(e, axis=-1, keepdims=True)                      # [TM, n_exp]

    # ---- iterative top-k routing + gather (rank-1: one scalar per token) ----
    # Tie-break: smallest index among equal maxima (torch.topk order on exact
    # ties may differ; benign for continuous softmax weights).
    e_iota = jax.lax.broadcasted_iota(jnp.int32, w.shape, 1)        # [TM, n_exp]
    remaining = w
    agg_scalar = jnp.zeros((x.shape[0], 1), jnp.float32)
    for _ in range(top_k):
        row_max = jnp.max(remaining, axis=-1, keepdims=True)
        is_max = remaining == row_max
        idx = jnp.min(jnp.where(is_max, e_iota, n_exp),
                      axis=-1, keepdims=True)                       # [TM, 1]
        sel = e_iota == idx                                         # one-hot
        gathered = jnp.sum(jnp.where(sel, h_front, 0.0),
                           axis=-1, keepdims=True)                  # h[:, idx]
        agg_scalar = agg_scalar + gathered / top_k
        remaining = jnp.where(sel, -jnp.inf, remaining)

    # ---- rank-1 out_proj: agg constant along hidden ----
    #   (broadcast(agg_scalar) @ w_out)[m, n] = agg_scalar[m] * colsum(w_out)[n]
    out = agg_scalar * cs_out_ref[...] + b_out_ref[...]             # [TM, out_pad]
    o_ref[...] = out.astype(o_ref.dtype)


def deepseek_moe_forward(x, params, *, top_k, tm=256):
    B, S, in_dim = x.shape
    M = B * S
    x2 = x.reshape(M, in_dim)

    w_in, b_in = params["w_in"], params["b_in"]
    w_r, b_r = params["w_r"], params["b_r"]
    w_out, b_out = params["w_out"], params["b_out"]
    n_exp = w_r.shape[1]
    out_dim = w_out.shape[1]

    # ---- wrapper-side parameter pre-fusion (tiny, one-time) ----
    hi = jax.lax.Precision.HIGHEST
    w_lg = jnp.dot(w_in, w_r, precision=hi)                         # [in_dim, n_exp]
    b_lg = jnp.dot(b_in, w_r, precision=hi) + b_r                   # [1, n_exp]
    w_hf = w_in[:, :n_exp]                                          # [in_dim, n_exp]
    b_hf = b_in[:, :n_exp]                                          # [1, n_exp]
    cs_out = jnp.sum(w_out, axis=0, keepdims=True)                  # [1, out_dim]

    # ---- tiling / padding: big token tiles, lane-dense output ----
    tm_eff = min(tm, _round_up(M, 8))          # don't over-pad tiny inputs
    M_pad = _round_up(M, tm_eff)
    out_pad = _round_up(out_dim, 128)          # unmasked full-lane stores
    if M_pad != M:
        x2 = jnp.pad(x2, ((0, M_pad - M), (0, 0)))
    cs_out_p = jnp.pad(cs_out, ((0, 0), (0, out_pad - out_dim)))
    b_out_p = jnp.pad(b_out, ((0, 0), (0, out_pad - out_dim)))

    kernel = functools.partial(moe_kernel, top_k=top_k, n_exp=n_exp)

    cost = pl.CostEstimate(
        flops=2 * M_pad * in_dim * (2 * n_exp) + 2 * M_pad * out_pad,
        transcendentals=M_pad * n_exp,
        bytes_accessed=4 * (M_pad * in_dim + M_pad * out_pad
                            + 2 * in_dim * n_exp + 2 * n_exp + 2 * out_pad),
    )

    out = pl.pallas_call(
        kernel,
        out_shape=jax.ShapeDtypeStruct((M_pad, out_pad), jnp.float32),
        grid_spec=pltpu.PrefetchScalarGridSpec(
            num_scalar_prefetch=0,
            grid=(M_pad // tm_eff,),
            in_specs=[
                pl.BlockSpec((tm_eff, in_dim), lambda i: (i, 0)),
                pl.BlockSpec((in_dim, n_exp), lambda i: (0, 0)),
                pl.BlockSpec((1, n_exp), lambda i: (0, 0)),
                pl.BlockSpec((in_dim, n_exp), lambda i: (0, 0)),
                pl.BlockSpec((1, n_exp), lambda i: (0, 0)),
                pl.BlockSpec((1, out_pad), lambda i: (0, 0)),
                pl.BlockSpec((1, out_pad), lambda i: (0, 0)),
            ],
            out_specs=pl.BlockSpec((tm_eff, out_pad), lambda i: (i, 0)),
        ),
        compiler_params=pltpu.CompilerParams(dimension_semantics=("parallel",)),
        cost_estimate=cost,
    )(x2, w_lg, b_lg, w_hf, b_hf, cs_out_p, b_out_p)

    return out[:M, :out_dim].reshape(B, S, out_dim)


def reference_forward(x, params, *, top_k):
    """Pure-JAX mirror of the PyTorch forward (backbone = identity)."""
    h = x @ params["w_in"] + params["b_in"][0]
    logits = h @ params["w_r"] + params["b_r"][0]
    w = jax.nn.softmax(logits, axis=-1)
    _, top_idx = jax.lax.top_k(w, top_k)                            # [..., top_k]
    agg = jnp.zeros_like(h)
    for k in range(top_k):
        idx = jnp.broadcast_to(top_idx[..., k:k + 1], h.shape)      # expand_as(h)
        agg = agg + jnp.take_along_axis(h, idx, axis=-1) / top_k
    return agg @ params["w_out"] + params["b_out"][0]


def init_params(key, in_dim, hidden, n_exp, out_dim):
    ks = jax.random.split(key, 6)
    scale = 0.05
    return {
        "w_in": scale * jax.random.normal(ks[0], (in_dim, hidden), jnp.float32),
        "b_in": scale * jax.random.normal(ks[1], (1, hidden), jnp.float32),
        "w_r": scale * jax.random.normal(ks[2], (hidden, n_exp), jnp.float32),
        "b_r": scale * jax.random.normal(ks[3], (1, n_exp), jnp.float32),
        "w_out": scale * jax.random.normal(ks[4], (hidden, out_dim), jnp.float32),
        "b_out": scale * jax.random.normal(ks[5], (1, out_dim), jnp.float32),
    }


if __name__ == "__main__":
    B, S = 2, 8
    in_dim, hidden, n_exp, top_k, out_dim = 32, 128, 8, 2, 16

    key = jax.random.PRNGKey(0)
    k_x, k_p = jax.random.split(key)
    x = jax.random.normal(k_x, (B, S, in_dim), jnp.float32)
    params = init_params(k_p, in_dim, hidden, n_exp, out_dim)

    out = deepseek_moe_forward(x, params, top_k=top_k)
    out = jax.block_until_ready(out)

    ref = reference_forward(x, params, top_k=top_k)
    np.testing.assert_allclose(np.asarray(out), np.asarray(ref), rtol=1e-4, atol=1e-5)

    print("KERNEL_OK")
</pallas_src>

<mosaic_0001>
module attributes {stable_mosaic.version = 11 : i64} {
  func.func @moe_kernel(%arg0: i32, %arg1: memref<16x32xf32, #tpu.memory_space<vmem>>, %arg2: memref<32x8xf32, #tpu.memory_space<vmem>>, %arg3: memref<1x8xf32, #tpu.memory_space<vmem>>, %arg4: memref<32x8xf32, #tpu.memory_space<vmem>>, %arg5: memref<1x8xf32, #tpu.memory_space<vmem>>, %arg6: memref<1x128xf32, #tpu.memory_space<vmem>>, %arg7: memref<1x128xf32, #tpu.memory_space<vmem>>, %arg8: memref<16x128xf32, #tpu.memory_space<vmem>>) attributes {dimension_semantics = [#tpu.dimension_semantics<parallel>], iteration_bounds = array<i64: 1>, scalar_prefetch = 0 : i64, scratch_operands = 0 : i64, tpu.core_type = #tpu.core_type<tc>, window_params = [{transform_indices = @transform_0, window_bounds = array<i64: 16, 32>}, {pipeline_mode = #tpu.pipeline_mode<synchronous>, transform_indices = @transform_1, window_bounds = array<i64: 32, 8>}, {pipeline_mode = #tpu.pipeline_mode<synchronous>, transform_indices = @transform_2, window_bounds = array<i64: 1, 8>}, {pipeline_mode = #tpu.pipeline_mode<synchronous>, transform_indices = @transform_3, window_bounds = array<i64: 32, 8>}, {pipeline_mode = #tpu.pipeline_mode<synchronous>, transform_indices = @transform_4, window_bounds = array<i64: 1, 8>}, {pipeline_mode = #tpu.pipeline_mode<synchronous>, transform_indices = @transform_5, window_bounds = array<i64: 1, 128>}, {pipeline_mode = #tpu.pipeline_mode<synchronous>, transform_indices = @transform_6, window_bounds = array<i64: 1, 128>}, {transform_indices = @transform_7, window_bounds = array<i64: 16, 128>}]} {
    %c0 = arith.constant 0 : index
    %c0_0 = arith.constant 0 : index
    %0 = vector.load %arg1[%c0, %c0_0] : memref<16x32xf32, #tpu.memory_space<vmem>>, vector<16x32xf32>
    %c0_1 = arith.constant 0 : index
    %c0_2 = arith.constant 0 : index
    %1 = vector.load %arg2[%c0_1, %c0_2] : memref<32x8xf32, #tpu.memory_space<vmem>>, vector<32x8xf32>
    %cst = arith.constant dense<0.000000e+00> : vector<16x8xf32>
    %2 = tpu.matmul %0, %1, %cst {dimension_numbers = #tpu.dot_dimension_numbers<[1], [0], [0], [1], [0, 0, 1, 1], [], []>} : vector<16x32xf32>, vector<32x8xf32>, vector<16x8xf32> -> vector<16x8xf32>
    %c0_3 = arith.constant 0 : index
    %c0_4 = arith.constant 0 : index
    %3 = vector.load %arg3[%c0_3, %c0_4] : memref<1x8xf32, #tpu.memory_space<vmem>>, vector<1x8xf32>
    %4 = vector.broadcast %3 : vector<1x8xf32> to vector<16x8xf32>
    %5 = arith.addf %2, %4 : vector<16x8xf32>
    %c0_5 = arith.constant 0 : index
    %c0_6 = arith.constant 0 : index
    %6 = vector.load %arg4[%c0_5, %c0_6] : memref<32x8xf32, #tpu.memory_space<vmem>>, vector<32x8xf32>
    %cst_7 = arith.constant dense<0.000000e+00> : vector<16x8xf32>
    %7 = tpu.matmul %0, %6, %cst_7 {dimension_numbers = #tpu.dot_dimension_numbers<[1], [0], [0], [1], [0, 0, 1, 1], [], []>} : vector<16x32xf32>, vector<32x8xf32>, vector<16x8xf32> -> vector<16x8xf32>
    %c0_8 = arith.constant 0 : index
    %c0_9 = arith.constant 0 : index
    %8 = vector.load %arg5[%c0_8, %c0_9] : memref<1x8xf32, #tpu.memory_space<vmem>>, vector<1x8xf32>
    %9 = vector.broadcast %8 : vector<1x8xf32> to vector<16x8xf32>
    %10 = arith.addf %7, %9 : vector<16x8xf32>
    %cst_10 = arith.constant dense<0xFF800000> : vector<16xf32>
    %11 = vector.multi_reduction <maximumf>, %5, %cst_10 [1] : vector<16x8xf32> to vector<16xf32>
    %12 = vector.shape_cast %11 : vector<16xf32> to vector<16x1xf32>
    %13 = vector.broadcast %12 : vector<16x1xf32> to vector<16x8xf32>
    %14 = arith.subf %5, %13 : vector<16x8xf32>
    %15 = math.exp %14 : vector<16x8xf32>
    %cst_11 = arith.constant dense<0.000000e+00> : vector<16xf32>
    %16 = vector.multi_reduction <add>, %15, %cst_11 [1] : vector<16x8xf32> to vector<16xf32>
    %17 = vector.shape_cast %16 : vector<16xf32> to vector<16x1xf32>
    %18 = vector.broadcast %17 : vector<16x1xf32> to vector<16x8xf32>
    %19 = arith.divf %15, %18 : vector<16x8xf32>
    %20 = tpu.iota {dimensions = array<i32: 1>} : vector<16x8xi32>
    %cst_12 = arith.constant 0.000000e+00 : f32
    %21 = vector.broadcast %cst_12 : f32 to vector<16x1xf32>
    %cst_13 = arith.constant dense<0xFF800000> : vector<16xf32>
    %22 = vector.multi_reduction <maximumf>, %19, %cst_13 [1] : vector<16x8xf32> to vector<16xf32>
    %23 = vector.shape_cast %22 : vector<16xf32> to vector<16x1xf32>
    %24 = vector.broadcast %23 : vector<16x1xf32> to vector<16x8xf32>
    %25 = arith.cmpf oeq, %19, %24 : vector<16x8xf32>
    %c8_i32 = arith.constant 8 : i32
    %26 = vector.broadcast %c8_i32 : i32 to vector<16x8xi32>
    %27 = arith.select %25, %20, %26 : vector<16x8xi1>, vector<16x8xi32>
    %cst_14 = arith.constant dense<2147483647> : vector<16xi32>
    %28 = vector.multi_reduction <minsi>, %27, %cst_14 [1] : vector<16x8xi32> to vector<16xi32>
    %29 = vector.shape_cast %28 : vector<16xi32> to vector<16x1xi32>
    %30 = vector.broadcast %29 : vector<16x1xi32> to vector<16x8xi32>
    %31 = arith.cmpi eq, %20, %30 : vector<16x8xi32>
    %cst_15 = arith.constant 0.000000e+00 : f32
    %32 = vector.broadcast %cst_15 : f32 to vector<16x8xf32>
    %33 = arith.select %31, %10, %32 : vector<16x8xi1>, vector<16x8xf32>
    %cst_16 = arith.constant dense<0.000000e+00> : vector<16xf32>
    %34 = vector.multi_reduction <add>, %33, %cst_16 [1] : vector<16x8xf32> to vector<16xf32>
    %35 = vector.shape_cast %34 : vector<16xf32> to vector<16x1xf32>
    %cst_17 = arith.constant 2.000000e+00 : f32
    %36 = vector.broadcast %cst_17 : f32 to vector<16x1xf32>
    %37 = arith.divf %35, %36 : vector<16x1xf32>
    %38 = arith.addf %21, %37 : vector<16x1xf32>
    %cst_18 = arith.constant 0xFF800000 : f32
    %39 = vector.broadcast %cst_18 : f32 to vector<16x8xf32>
    %40 = arith.select %31, %39, %19 : vector<16x8xi1>, vector<16x8xf32>
    %cst_19 = arith.constant dense<0xFF800000> : vector<16xf32>
    %41 = vector.multi_reduction <maximumf>, %40, %cst_19 [1] : vector<16x8xf32> to vector<16xf32>
    %42 = vector.shape_cast %41 : vector<16xf32> to vector<16x1xf32>
    %43 = vector.broadcast %42 : vector<16x1xf32> to vector<16x8xf32>
    %44 = arith.cmpf oeq, %40, %43 : vector<16x8xf32>
    %c8_i32_20 = arith.constant 8 : i32
    %45 = vector.broadcast %c8_i32_20 : i32 to vector<16x8xi32>
    %46 = arith.select %44, %20, %45 : vector<16x8xi1>, vector<16x8xi32>
    %cst_21 = arith.constant dense<2147483647> : vector<16xi32>
    %47 = vector.multi_reduction <minsi>, %46, %cst_21 [1] : vector<16x8xi32> to vector<16xi32>
    %48 = vector.shape_cast %47 : vector<16xi32> to vector<16x1xi32>
    %49 = vector.broadcast %48 : vector<16x1xi32> to vector<16x8xi32>
    %50 = arith.cmpi eq, %20, %49 : vector<16x8xi32>
    %cst_22 = arith.constant 0.000000e+00 : f32
    %51 = vector.broadcast %cst_22 : f32 to vector<16x8xf32>
    %52 = arith.select %50, %10, %51 : vector<16x8xi1>, vector<16x8xf32>
    %cst_23 = arith.constant dense<0.000000e+00> : vector<16xf32>
    %53 = vector.multi_reduction <add>, %52, %cst_23 [1] : vector<16x8xf32> to vector<16xf32>
    %54 = vector.shape_cast %53 : vector<16xf32> to vector<16x1xf32>
    %cst_24 = arith.constant 2.000000e+00 : f32
    %55 = vector.broadcast %cst_24 : f32 to vector<16x1xf32>
    %56 = arith.divf %54, %55 : vector<16x1xf32>
    %57 = arith.addf %38, %56 : vector<16x1xf32>
    %c0_25 = arith.constant 0 : index
    %c0_26 = arith.constant 0 : index
    %58 = vector.load %arg6[%c0_25, %c0_26] : memref<1x128xf32, #tpu.memory_space<vmem>>, vector<1x128xf32>
    %59 = vector.broadcast %57 : vector<16x1xf32> to vector<16x128xf32>
    %60 = vector.broadcast %58 : vector<1x128xf32> to vector<16x128xf32>
    %61 = arith.mulf %59, %60 : vector<16x128xf32>
    %c0_27 = arith.constant 0 : index
    %c0_28 = arith.constant 0 : index
    %62 = vector.load %arg7[%c0_27, %c0_28] : memref<1x128xf32, #tpu.memory_space<vmem>>, vector<1x128xf32>
    %63 = vector.broadcast %62 : vector<1x128xf32> to vector<16x128xf32>
    %64 = arith.addf %61, %63 : vector<16x128xf32>
    %c0_29 = arith.constant 0 : index
    %c0_30 = arith.constant 0 : index
    %65 = vector.load %arg8[%c0_29, %c0_30] : memref<16x128xf32, #tpu.memory_space<vmem>>, vector<16x128xf32>
    tpu.vector_store %arg8[%c0_29, %c0_30], %64 {strides = array<i32>} : memref<16x128xf32, #tpu.memory_space<vmem>>, vector<16x128xf32>,
    return
  }
  func.func @transform_0(%arg0: i32) -> (i32, i32) {
    %c0_i32 = arith.constant 0 : i32
    %c0_i32_0 = arith.constant 0 : i32
    return %arg0, %c0_i32 : i32, i32
  }
  func.func @transform_1(%arg0: i32) -> (i32, i32) {
    %c0_i32 = arith.constant 0 : i32
    %c0_i32_0 = arith.constant 0 : i32
    %c0_i32_1 = arith.constant 0 : i32
    return %c0_i32, %c0_i32_0 : i32, i32
  }
  func.func @transform_2(%arg0: i32) -> (i32, i32) {
    %c0_i32 = arith.constant 0 : i32
    %c0_i32_0 = arith.constant 0 : i32
    %c0_i32_1 = arith.constant 0 : i32
    return %c0_i32, %c0_i32_0 : i32, i32
  }
  func.func @transform_3(%arg0: i32) -> (i32, i32) {
    %c0_i32 = arith.constant 0 : i32
    %c0_i32_0 = arith.constant 0 : i32
    %c0_i32_1 = arith.constant 0 : i32
    return %c0_i32, %c0_i32_0 : i32, i32
  }
  func.func @transform_4(%arg0: i32) -> (i32, i32) {
    %c0_i32 = arith.constant 0 : i32
    %c0_i32_0 = arith.constant 0 : i32
    %c0_i32_1 = arith.constant 0 : i32
    return %c0_i32, %c0_i32_0 : i32, i32
  }
  func.func @transform_5(%arg0: i32) -> (i32, i32) {
    %c0_i32 = arith.constant 0 : i32
    %c0_i32_0 = arith.constant 0 : i32
    %c0_i32_1 = arith.constant 0 : i32
    return %c0_i32, %c0_i32_0 : i32, i32
  }
  func.func @transform_6(%arg0: i32) -> (i32, i32) {
    %c0_i32 = arith.constant 0 : i32
    %c0_i32_0 = arith.constant 0 : i32
    %c0_i32_1 = arith.constant 0 : i32
    return %c0_i32, %c0_i32_0 : i32, i32
  }
  func.func @transform_7(%arg0: i32) -> (i32, i32) {
    %c0_i32 = arith.constant 0 : i32
    %c0_i32_0 = arith.constant 0 : i32
    return %arg0, %c0_i32 : i32, i32
  }
}

</mosaic_0001>

<bundles_post_ra>
// kernel: tpu_custom_call.1
= control target key start
LH: loop header
LB: loop body
LE: loop exit
PB: predicated region body
PF: predicated region fallthrough
CT: control target
= control target key end

     0   :  { %s494_s0 = inlined_call_operand.vmem [shape: f32[16,32], index: 0, kind: input, shape index: {}]   ;;  %s495_s1 = inlined_call_operand.vmem [shape: f32[32,8], index: 1, kind: input, shape index: {}]   ;;  %s496_s2 = inlined_call_operand.vmem [shape: f32[1,8], index: 2, kind: input, shape index: {}]   ;;  %s497_s3 = inlined_call_operand.vmem [shape: f32[32,8], index: 3, kind: input, shape index: {}]   ;;  %s498_s4 = inlined_call_operand.vmem [shape: f32[1,8], index: 4, kind: input, shape index: {}]   ;;  %s499_s5 = inlined_call_operand.vmem [shape: f32[1,128], index: 5, kind: input, shape index: {}]   ;;  %s500_s6 = inlined_call_operand.vmem [shape: f32[1,128], index: 6, kind: input, shape index: {}]   ;;  %s501_s7 = inlined_call_operand.hbm [shape: f32[16,128], index: 7, kind: output, shape index: {}]  }
   0x1   :  { %v32_v0 = vld [vmem:[%s495_s1 + $0x18] sm:$0xff]  ;;  %v31_v1 = vld [vmem:[%s495_s1 + $0x10] sm:$0xff]  ;;  %v30_v2 = vld [vmem:[%s495_s1 + $0x8] sm:$0xff] }
   0x2   :  { %56 = vmatpush.msra.mxu0 %v32_v0  ;;  %302 = vmatpush.msra.mxu2 %v32_v0 }
   0x4   :  { %57 = vmatpush.msra.mxu0 %v31_v1  ;;  %303 = vmatpush.msra.mxu2 %v31_v1 }
   0x5   :  { %12 = vsyncpa [#allocation3], 0  ;;  %v29_v3 = vld [vmem:[%s495_s1] sm:$0xff]  ;;  %vm37_vm0 = vcmask 261120   ;;  %v418_v5 = vld [vmem:[%s494_s0 + $0x8] sm:$0xff]  ;;  %vm98_vm1 = vcmask 64512   ;;  %v147_v53 = vlaneseq }
   0x6   :  { %58 = vmatpush.msra.mxu0 %v30_v2  ;;  %304 = vmatpush.msra.mxu2 %v30_v2  ;;  %v413_v4 = vld [vmem:[%s494_s0] sm:$0xff]  ;;  %v70_v49 = vld [vmem:[%s497_s3 + $0x18] sm:$0xff]  ;;  %v69_v50 = vld [vmem:[%s497_s3 + $0x10] sm:$0xff]  ;;  %s355_s24 = smov [#allocation2]   ;;  %s357_s28 = smov 8  }
   0x7   :  { %v314_v6 = vld [vmem:[%s496_s2] ss:$0 sm:$0xff]  ;;  %87 = vmatpush.msra.mxu1 %v70_v49  ;;  %306 = vmatpush.msra.mxu3 %v70_v49  ;;  %v68_v51 = vld [vmem:[%s497_s3 + $0x8] sm:$0xff]  ;;  %v452_v54 = vand.u32 127, %v147_v53  ;;  %s284_s25 = sshll.u32 %s355_s24, 4  ;;  %s285_s25 = int_to_ptr.vmem [resolvable:$true] %s284_s25 }
   0x8   :  { %59 = vmatpush.msra.mxu0 %v29_v3  ;;  %305 = vmatpush.msra.mxu2 %v29_v3  ;;  %v67_v52 = vld [vmem:[%s497_s3] sm:$0xff] }
   0x9   :  { %298 = vmatmul.msk.f32.vlgmr.msra.gmra.mxu0 %vm37_vm0, %v413_v4  ;;  %299 = vmatmul.msk.f32.vlgmr.msra.gmra.mxu2 %vm37_vm0, %v418_v5 }
   0xa   :  { %88 = vmatpush.msra.mxu1 %v69_v50  ;;  %307 = vmatpush.msra.mxu3 %v69_v50 }
   0xc   :  { %89 = vmatpush.msra.mxu1 %v68_v51  ;;  %308 = vmatpush.msra.mxu3 %v68_v51 }
   0xe   :  { %90 = vmatpush.msra.mxu1 %v67_v52  ;;  %309 = vmatpush.msra.mxu3 %v67_v52 }
   0xf   :  { %300 = vmatmul.msk.f32.vlgmr.msra.gmra.mxu1 %vm37_vm0, %v413_v4  ;;  %301 = vmatmul.msk.f32.vlgmr.msra.gmra.mxu3 %vm37_vm0, %v418_v5 }
  0x86   :  { %v61_v7 = vpop.f32.mrf.mxu0 }
  0x87   :  { %v62_v8 = vadd.f32 %v314_v6, %v61_v7 }
  0x89   :  { %v99_v9 = vsel %vm98_vm1, %v62_v8, -inf }
  0x8a   :  { %100 = vmax.xlane.f32.xlu0 %v99_v9 }
  0x8c   :  { %v64_v10 = vpop.f32.mrf.mxu2 }
  0x8d   :  { %v65_v11 = vadd.f32 %v314_v6, %v64_v10 }
  0x8f   :  { %v102_v12 = vsel %vm98_vm1, %v65_v11, -inf }
  0x92   :  { %103 = vmax.xlane.f32.xlu0 %v102_v12 }
  0xfd   :  { %v101_v13 = vpop.xlane.xlu0 %100 }
  0xfe   :  { %v105_v14 = vsub.f32 %v62_v8, %v101_v13 }
 0x100   :  { %v107_v15 = vmul.f32 1.442695, %v105_v14 }
 0x102   :  { %318 = vpow2.f32 %v107_v15 }
 0x105   :  { %v104_v16 = vpop.xlane.xlu0 %103 }
 0x106   :  { %v106_v17 = vsub.f32 %v65_v11, %v104_v16 }
 0x108   :  { %v319_v18 = vpop.eup %318  ;;  %v109_v19 = vmul.f32 1.442695, %v106_v17 }
 0x109   :  { %v111_v20 = vsel %vm98_vm1, %v319_v18, 0.0 }
 0x10a   :  { %320 = vpow2.f32 %v109_v19  ;;  %112 = vadd.xlane.f32.xlu1 %v111_v20 }
 0x110   :  { %v321_v21 = vpop.eup %320 }
 0x111   :  { %v114_v22 = vsel %vm98_vm1, %v321_v21, 0.0 }
 0x112   :  { %115 = vadd.xlane.f32.xlu1 %v114_v22 }
 0x17d   :  { %v113_v23 = vpop.xlane.xlu1 %112 }
 0x17e   :  { %322 = vrcp.f32 %v113_v23  ;;  %v128_v28 = vand.u32 2147483648, %v113_v23  ;;  %v126_v30 = vand.u32 2147483647, %v113_v23  ;;  %vm122_vm3 = vweird.f32 %v113_v23 }
 0x180   :  { %v129_v33 = vor.u32 1.1754944e-38, %v128_v28  ;;  %vm127_vm5 = vcmp.eq.f32.partialorder %v126_v30, 8.507059e+37 }
 0x184   :  { %v323_v24 = vpop.eup %322 }
 0x185   :  { %v118_v25 = vmul.f32 %v323_v24, %v113_v23  ;;  %v116_v26 = vpop.xlane.xlu1 %115  ;;  %vm123_vm2 = vweird.f32 %v323_v24 }
 0x186   :  { %324 = vrcp.f32 %v116_v26  ;;  %vm124_vm4 = vmor %vm122_vm3, %vm123_vm2  ;;  %v143_v39 = vand.u32 2147483648, %v116_v26  ;;  %v141_v41 = vand.u32 2147483647, %v116_v26  ;;  %vm137_vm7 = vweird.f32 %v116_v26 }
 0x187   :  { %v119_v27 = vsub.f32 1.0, %v118_v25 }
 0x188   :  { %v144_v44 = vor.u32 1.1754944e-38, %v143_v39  ;;  %vm142_vm9 = vcmp.eq.f32.partialorder %v141_v41, 8.507059e+37  ;;  %v95_v39 = vpop.f32.mrf.mxu3 }
 0x189   :  { %v120_v29 = vmul.f32 %v323_v24, %v119_v27 }
 0x18b   :  { %v121_v31 = vadd.f32 %v323_v24, %v120_v29 }
 0x18c   :  { %v325_v32 = vpop.eup %324 }
 0x18d   :  { %v133_v34 = vmul.f32 %v325_v32, %v116_v26  ;;  %v125_v35 = vsel %vm124_vm4, %v323_v24, %v121_v31  ;;  %vm138_vm6 = vweird.f32 %v325_v32  ;;  %v315_v31 = vld [vmem:[%s498_s4] ss:$0 sm:$0xff] }
 0x18e   :  { %v130_v36 = vsel %vm127_vm5, %v129_v33, %v125_v35  ;;  %vm139_vm8 = vmor %vm137_vm7, %vm138_vm6  ;;  %v92_v33 = vpop.f32.mrf.mxu1 }
 0x18f   :  { %v134_v37 = vsub.f32 1.0, %v133_v34  ;;  %v431_v38 = vmul.f32 %v319_v18, %v130_v36  ;;  %v93_v35 = vadd.f32 %v315_v31, %v92_v33 }
 0x191   :  { %v135_v40 = vmul.f32 %v325_v32, %v134_v37  ;;  %v149_v42 = vsel %vm98_vm1, %v431_v38, -inf }
 0x192   :  { %150 = vmax.xlane.f32.xlu2 %v149_v42 }
 0x193   :  { %v136_v43 = vadd.f32 %v325_v32, %v135_v40 }
 0x195   :  { %v140_v45 = vsel %vm139_vm8, %v325_v32, %v136_v43  ;;  %v96_v43 = vadd.f32 %v315_v31, %v95_v39 }
 0x196   :  { %v145_v46 = vsel %vm142_vm9, %v144_v44, %v140_v45 }
 0x197   :  { %v146_v47 = vmul.f32 %v321_v21, %v145_v46 }
 0x199   :  { %v152_v48 = vsel %vm98_vm1, %v146_v47, -inf }
 0x19a   :  { %153 = vmax.xlane.f32.xlu2 %v152_v48 }
 0x205   :  { %v151_v55 = vpop.xlane.xlu2 %150 }
 0x206   :  { %vm155_vm10 = vcmp.eq.f32.partialorder %v431_v38, %v151_v55 }
 0x207   :  { %v157_v56 = vsel %vm155_vm10, %v452_v54, 8 }
 0x208   :  { %v159_v57 = vsel %vm98_vm1, %v157_v56, 2147483647 }
 0x209   :  { %v161_v58 = vshra.s32 %v159_v57, 16  ;;  %v160_v1 = vand.u32 65535, %v159_v57 }
 0x20b   :  { %v163_v59 = vcvt.s32.f32 %v161_v58  ;;  %v162_v3 = vcvt.s32.f32 %v160_v1  ;;  %v354_v1 = vmov 2.0  }
 0x20c   :  { %326 = vrcp.f32 %v354_v1 }
 0x20d   :  { %164 = vmin.xlane.f32.xlu0 %v163_v59  ;;  %v154_v60 = vpop.xlane.xlu2 %153 }
 0x20e   :  { %vm156_vm11 = vcmp.eq.f32.partialorder %v146_v47, %v154_v60 }
 0x20f   :  { %v158_v61 = vsel %vm156_vm11, %v452_v54, 8 }
 0x210   :  { %v174_v62 = vsel %vm98_vm1, %v158_v61, 2147483647 }
 0x211   :  { %v176_v63 = vshra.s32 %v174_v62, 16  ;;  %v175_v5 = vand.u32 65535, %v174_v62 }
 0x213   :  { %v178_v0 = vcvt.s32.f32 %v176_v63  ;;  %v177_v7 = vcvt.s32.f32 %v175_v5 }
 0x215   :  { %179 = vmin.xlane.f32.xlu1 %v178_v0 }
 0x280   :  { %v165_v2 = vpop.xlane.xlu0 %164 }
 0x281   :  { %vm166_vm12 = vcmp.eq.f32.partialorder %v163_v59, %v165_v2  ;;  %v171_v9 = vcvt.f32.s32 %v165_v2  ;;  %v327_v2 = vpop.eup %326 }
 0x282   :  { %v167_v4 = vsel %vm166_vm12, %v162_v3, inf  ;;  %v200_v3 = vmul.f32 2.0, %v327_v2  ;;  %vm204_vm7 = vweird.f32 %v327_v2 }
 0x283   :  { %168 = vmin.xlane.f32.xlu2 %v167_v4  ;;  %v172_v11 = vshll.u32 %v171_v9, 16 }
 0x284   :  { %v201_v4 = vsub.f32 1.0, %v200_v3 }
 0x286   :  { %v202_v5 = vmul.f32 %v327_v2, %v201_v4 }
 0x288   :  { %v180_v6 = vpop.xlane.xlu1 %179 }
 0x289   :  { %vm181_vm13 = vcmp.eq.f32.partialorder %v178_v0, %v180_v6  ;;  %v186_v14 = vcvt.f32.s32 %v180_v6  ;;  %v203_v6 = vadd.f32 %v327_v2, %v202_v5 }
 0x28a   :  { %v182_v8 = vsel %vm181_vm13, %v177_v7, inf }
 0x28b   :  { %183 = vmin.xlane.f32.xlu0 %v182_v8  ;;  %v187_v18 = vshll.u32 %v186_v14, 16  ;;  %v205_v7 = vsel %vm204_vm7, %v327_v2, %v203_v6 }
 0x2f6   :  { %v169_v10 = vpop.xlane.xlu2 %168 }
 0x2f7   :  { %v170_v12 = vcvt.f32.s32 %v169_v10 }
 0x2f9   :  { %v173_v13 = vadd.s32 %v172_v11, %v170_v12  ;;  %v317_v12 = vld [vmem:[%s500_s6] ss:$0 sm:$0xff]  ;;  %s356_s6 = smov 128  }
 0x2fb   :  { %vm189_vm14 = vcmp.eq.s32.totalorder %v452_v54, %v173_v13 }
 0x2fc   :  { %v210_v15 = vsel %vm189_vm14, -inf, %v431_v38  ;;  %v191_v36 = vsel %vm189_vm14, %v93_v35, 0.0 }
 0x2fd   :  { %v212_v16 = vsel %vm98_vm1, %v210_v15, -inf  ;;  %v193_v37 = vsel %vm98_vm1, %v191_v36, 0.0 }
 0x2fe   :  { %213 = vmax.xlane.f32.xlu1 %v212_v16  ;;  %v184_v17 = vpop.xlane.xlu0 %183 }
 0x2ff   :  { %v185_v19 = vcvt.f32.s32 %v184_v17 }
 0x301   :  { %v188_v20 = vadd.s32 %v187_v18, %v185_v19 }
 0x303   :  { %vm190_vm15 = vcmp.eq.s32.totalorder %v452_v54, %v188_v20 }
 0x304   :  { %v211_v21 = vsel %vm190_vm15, -inf, %v146_v47  ;;  %v192_v45 = vsel %vm190_vm15, %v96_v43, 0.0 }
 0x305   :  { %v215_v22 = vsel %vm98_vm1, %v211_v21, -inf  ;;  %v196_v49 = vsel %vm98_vm1, %v192_v45, 0.0 }
 0x306   :  { %216 = vmax.xlane.f32.xlu2 %v215_v22 }
 0x371   :  { %v214_v23 = vpop.xlane.xlu1 %213 }
 0x372   :  { %vm218_vm0 = vcmp.eq.f32.partialorder %v210_v15, %v214_v23 }
 0x373   :  { %v220_v24 = vsel %vm218_vm0, %v452_v54, 8 }
 0x374   :  { %v222_v25 = vsel %vm98_vm1, %v220_v24, 2147483647 }
 0x375   :  { %v224_v26 = vshra.s32 %v222_v25, 16  ;;  %v223_v38 = vand.u32 65535, %v222_v25 }
 0x377   :  { %v226_v27 = vcvt.s32.f32 %v224_v26  ;;  %v225_v41 = vcvt.s32.f32 %v223_v38 }
 0x379   :  { %227 = vmin.xlane.f32.xlu0 %v226_v27  ;;  %v217_v28 = vpop.xlane.xlu2 %216 }
 0x37a   :  { %vm219_vm2 = vcmp.eq.f32.partialorder %v211_v21, %v217_v28 }
 0x37b   :  { %v221_v29 = vsel %vm219_vm2, %v452_v54, 8 }
 0x37c   :  { %v237_v30 = vsel %vm98_vm1, %v221_v29, 2147483647 }
 0x37d   :  { %v239_v32 = vshra.s32 %v237_v30, 16  ;;  %v238_v44 = vand.u32 65535, %v237_v30 }
 0x37f   :  { %v241_v34 = vcvt.s32.f32 %v239_v32  ;;  %v240_v47 = vcvt.s32.f32 %v238_v44 }
 0x381   :  { %242 = vmin.xlane.f32.xlu1 %v241_v34 }
 0x389   :  { %194 = vadd.xlane.f32.xlu1 %v193_v37 }
 0x3ec   :  { %v228_v40 = vpop.xlane.xlu0 %227 }
 0x3ed   :  { %vm229_vm3 = vcmp.eq.f32.partialorder %v226_v27, %v228_v40  ;;  %v234_v50 = vcvt.f32.s32 %v228_v40 }
 0x3ee   :  { %v230_v42 = vsel %vm229_vm3, %v225_v41, inf }
 0x3ef   :  { %231 = vmin.xlane.f32.xlu2 %v230_v42  ;;  %v235_v52 = vshll.u32 %v234_v50, 16 }
 0x3f4   :  { %v243_v46 = vpop.xlane.xlu1 %242 }
 0x3f5   :  { %vm244_vm4 = vcmp.eq.f32.partialorder %v241_v34, %v243_v46  ;;  %v249_v56 = vcvt.f32.s32 %v243_v46 }
 0x3f6   :  { %v245_v48 = vsel %vm244_vm4, %v240_v47, inf }
 0x3f7   :  { %246 = vmin.xlane.f32.xlu0 %v245_v48  ;;  %197 = vadd.xlane.f32.xlu2 %v196_v49  ;;  %v250_v60 = vshll.u32 %v249_v56, 16 }
 0x3fc   :  { %v195_v8 = vpop.xlane.xlu1 %194 }
 0x3fd   :  { %v206_v10 = vmul.f32 %v205_v7, %v195_v8 }
 0x462   :  { %v232_v51 = vpop.xlane.xlu2 %231 }
 0x463   :  { %v233_v53 = vcvt.f32.s32 %v232_v51 }
 0x465   :  { %v236_v55 = vadd.s32 %v235_v52, %v233_v53 }
 0x467   :  { %vm252_vm5 = vcmp.eq.s32.totalorder %v452_v54, %v236_v55 }
 0x468   :  { %v254_v57 = vsel %vm252_vm5, %v93_v35, 0.0 }
 0x469   :  { %v256_v58 = vsel %vm98_vm1, %v254_v57, 0.0 }
 0x46a   :  { %257 = vadd.xlane.f32.xlu0 %v256_v58  ;;  %v247_v59 = vpop.xlane.xlu0 %246  ;;  %v198_v15 = vpop.xlane.xlu2 %197 }
 0x46b   :  { %v248_v61 = vcvt.f32.s32 %v247_v59  ;;  %v207_v18 = vmul.f32 %v205_v7, %v198_v15 }
 0x46d   :  { %v251_v62 = vadd.s32 %v250_v60, %v248_v61 }
 0x46f   :  { %vm253_vm6 = vcmp.eq.s32.totalorder %v452_v54, %v251_v62  ;;  %v316_v54 = vld [vmem:[%s499_s5] ss:$0 sm:$0xff]  ;;  %s286_s5 = sshll.u32 %s501_s7, 4  ;;  %s287_s5 = int_to_ptr.hbm [resolvable:$true] %s286_s5 }
 0x470   :  { %v255_v63 = vsel %vm253_vm6, %v96_v43, 0.0 }
 0x471   :  { %v259_v0 = vsel %vm98_vm1, %v255_v63, 0.0 }
 0x472   :  { %260 = vadd.xlane.f32.xlu1 %v259_v0 }
 0x4dd   :  { %v258_v9 = vpop.xlane.xlu0 %257 }
 0x4de   :  { %v262_v11 = vmul.f32 %v258_v9, %v205_v7 }
 0x4e0   :  { %v264_v13 = vadd.f32 %v262_v11, %v206_v10 }
 0x4e2   :  { %v270_v14 = vmul.f32 %v316_v54, %v264_v13 }
 0x4e4   :  { %v276_v16 = vadd.f32 %v317_v12, %v270_v14 }
 0x4e5   :  { %v261_v17 = vpop.xlane.xlu1 %260 }
 0x4e6   :  { %278 = vst [vmem:[#allocation2] sm:$0xff] %v276_v16  ;;  %v263_v19 = vmul.f32 %v261_v17, %v205_v7 }
 0x4e8   :  { %v265_v20 = vadd.f32 %v263_v19, %v207_v18 }
 0x4ea   :  { %v271_v21 = vmul.f32 %v316_v54, %v265_v20 }
 0x4ec   :  { %v277_v22 = vadd.f32 %v317_v12, %v271_v21 }
 0x4ee   :  { %279 = vst [vmem:[#allocation2 + $0x8] sm:$0xff] %v277_v22 }
 0x4ef   :  { %292 = dma.vmem_to_hbm [thread:$0]  %s285_s25, 256, %s287_s5, [#allocation3], %s356_s6, %s356_s6, %s357_s28  }
 0x4f0   :  { %352 = dma.done.wait [#allocation3], 256  }
 0x4f1   :  { %353 = vsyncadd [#allocation3], 4294967040 }
 0x4f2   :  { %297 = vsyncpa [#allocation3], 1 }

</bundles_post_ra>
